<compile_context>
chip_gen: v6e
topology: v6e:2x2x1
jax: 0.10.0
libtpu: 0.0.40
codegen_flags: <defaults>
</compile_context>

<pallas_src>
import functools

import jax
import jax.numpy as jnp
from jax.experimental import pallas as pl
from jax.experimental.pallas import tpu as pltpu


def _tab_kernel(k, dilation, pad_al, use_resample, *refs):
    """One batch row per grid step. Activations are (C, T_pad) lane-dense tiles."""
    if use_resample:
        (x_ref, w1_ref, b1_ref, w2_ref, b2_ref, wr_ref, br_ref,
         o_ref, xpad, hpad) = refs
    else:
        x_ref, w1_ref, b1_ref, w2_ref, b2_ref, o_ref, xpad, hpad = refs

    x = x_ref[0]                       # (Cin, L) in compute dtype
    l = x.shape[-1]

    # Causal zero front-padding.  Re-zero the pad region every step (cheap,
    # one lane-tile) so the kernel is correct even when the "parallel" grid is
    # split across TensorCores (each core has its own scratch instance).
    if pad_al > 0:
        xpad[:, :pad_al] = jnp.zeros((xpad.shape[0], pad_al), xpad.dtype)
        hpad[:, :pad_al] = jnp.zeros((hpad.shape[0], pad_al), hpad.dtype)
    xpad[:, pad_al:] = x

    def dilated_conv(src_pad, w_ref, b_ref):
        # Tap kk multiplies the input shifted right (causally) by
        # (K-1-kk)*dilation; the shift is realised as a static slice of the
        # front-padded scratch -> K accumulating MXU dots, f32 accumulator.
        acc = None
        for kk in range(k):
            off = pad_al - (k - 1 - kk) * dilation      # static Python int
            tap = src_pad[:, off:off + l]
            d = jnp.dot(w_ref[kk], tap, preferred_element_type=jnp.float32)
            acc = d if acc is None else acc + d
        return acc + b_ref[...]

    # conv1 (+ folded BN1) + ReLU; SpatialDropout(p=0)/eval is identity.
    h = jnp.maximum(dilated_conv(xpad, w1_ref, b1_ref), 0.0)

    if use_resample:
        ident = jnp.dot(wr_ref[...], x,
                        preferred_element_type=jnp.float32) + br_ref[...]
    else:
        # TODO(synk): with compute_dtype=bf16 the skip connection is the
        # bf16-cast input (slight precision loss vs the f32 torch residual).
        ident = x.astype(jnp.float32)

    # conv2 (+ folded BN2) + ReLU.
    hpad[:, pad_al:] = h.astype(hpad.dtype)
    h2 = jnp.maximum(dilated_conv(hpad, w2_ref, b2_ref), 0.0)

    # Sigmoid via EUP exp + reciprocal (approx=True gives ~1e-3 error; keep
    # exact here for the parity check), then residual add in f32.
    sig = pl.reciprocal(1.0 + jnp.exp(-h2), approx=False)
    o_ref[0] = (sig + ident).astype(o_ref.dtype)


def temporal_aware_block(x, params, *, kernel_size, dilation, eps=1e-5,
                         compute_dtype=jnp.float32):
    """Forward pass of Temporal_Aware_Block (eval mode). x: (B, C_in, T) f32."""
    b, c_in, t = x.shape
    filters = params["w1"].shape[0]
    k = kernel_size
    use_resample = (c_in != filters)

    # ---- fold eval-mode BatchNorm into conv weights/biases (exact) ----
    s1 = params["bn1_gamma"] / jnp.sqrt(params["bn1_var"] + eps)
    t1 = params["bn1_beta"] - params["bn1_mean"] * s1
    s2 = params["bn2_gamma"] / jnp.sqrt(params["bn2_var"] + eps)
    t2 = params["bn2_beta"] - params["bn2_mean"] * s2

    # Tap-major weights: w[kk] multiplies input shifted right by (K-1-kk)*dil.
    w1 = jnp.transpose(params["w1"] * s1[:, None, None], (2, 0, 1))   # (K,F,Cin)
    b1 = (params["b1"] * s1 + t1)[:, None]                            # (F,1)
    w2 = jnp.transpose(params["w2"] * s2[:, None, None], (2, 0, 1))   # (K,F,F)
    b2 = (params["b2"] * s2 + t2)[:, None]                            # (F,1)

    # ---- lane-dense time padding + causal front-pad extent ----
    t_pad = ((t + 127) // 128) * 128
    pad = (k - 1) * dilation
    pad_al = ((pad + 127) // 128) * 128 if pad > 0 else 0
    if t_pad != t:
        x = jnp.pad(x, ((0, 0), (0, 0), (0, t_pad - t)))

    xk = x.astype(compute_dtype)
    operands = [xk,
                w1.astype(compute_dtype), b1.astype(jnp.float32),
                w2.astype(compute_dtype), b2.astype(jnp.float32)]
    in_specs = [
        pl.BlockSpec((1, c_in, t_pad), lambda i: (i, 0, 0)),      # activations
        pl.BlockSpec((k, filters, c_in), lambda i: (0, 0, 0)),    # conv1 W
        pl.BlockSpec((filters, 1), lambda i: (0, 0)),             # conv1 b
        pl.BlockSpec((k, filters, filters), lambda i: (0, 0, 0)),  # conv2 W
        pl.BlockSpec((filters, 1), lambda i: (0, 0)),             # conv2 b
    ]
    if use_resample:
        operands += [params["wr"][:, :, 0].astype(compute_dtype),
                     params["br"][:, None].astype(jnp.float32)]
        in_specs += [pl.BlockSpec((filters, c_in), lambda i: (0, 0)),
                     pl.BlockSpec((filters, 1), lambda i: (0, 0))]

    # Explicit VMEM budget from the per-step working set (safe on v5e/v6e/v7x).
    itemsize = jnp.dtype(compute_dtype).itemsize
    est = (2 * c_in * t_pad * itemsize                     # input dbl-buffer
           + 2 * filters * t_pad * 4                       # output dbl-buffer
           + (c_in + filters) * (pad_al + t_pad) * itemsize  # pad scratches
           + 2 * 4 * (k * filters * (c_in + filters) + filters * (c_in + 2))
           + 8 * filters * t_pad * 4)                      # live intermediates
    vmem_limit = int(min(max(2 * est, 16 << 20), 48 << 20))

    kernel = functools.partial(_tab_kernel, k, dilation, pad_al, use_resample)
    out = pl.pallas_call(
        kernel,
        out_shape=jax.ShapeDtypeStruct((b, filters, t_pad), jnp.float32),
        grid=(b,),
        in_specs=in_specs,
        out_specs=pl.BlockSpec((1, filters, t_pad), lambda i: (i, 0, 0)),
        scratch_shapes=[pltpu.VMEM((c_in, pad_al + t_pad), compute_dtype),
                        pltpu.VMEM((filters, pad_al + t_pad), compute_dtype)],
        compiler_params=pltpu.CompilerParams(
            dimension_semantics=("parallel",),
            vmem_limit_bytes=vmem_limit),
    )(*operands)

    return out[:, :, :t]


def _reference(x, params, *, kernel_size, dilation, eps=1e-5):
    """Pure-JAX reference implementing the same math (for validation)."""
    def causal_conv(h, w, bias):
        o, i, kk_ = w.shape
        pad = (kk_ - 1) * dilation
        hp = jnp.pad(h, ((0, 0), (0, 0), (pad, 0)))
        out = jnp.zeros((h.shape[0], o, h.shape[2]), jnp.float32)
        for kk in range(kk_):
            out += jnp.einsum("oi,bit->bot", w[:, :, kk],
                              hp[:, :, kk * dilation: kk * dilation + h.shape[2]])
        return out + bias[None, :, None]

    def bn(h, g, bta, m, v):
        return (h - m[None, :, None]) / jnp.sqrt(v[None, :, None] + eps) \
            * g[None, :, None] + bta[None, :, None]

    h = causal_conv(x, params["w1"], params["b1"])
    h = jax.nn.relu(bn(h, params["bn1_gamma"], params["bn1_beta"],
                       params["bn1_mean"], params["bn1_var"]))
    h = causal_conv(h, params["w2"], params["b2"])
    h = jax.nn.relu(bn(h, params["bn2_gamma"], params["bn2_beta"],
                       params["bn2_mean"], params["bn2_var"]))
    if x.shape[1] != h.shape[1]:
        ident = jnp.einsum("oi,bit->bot", params["wr"][:, :, 0], x) \
            + params["br"][None, :, None]
    else:
        ident = x
    return jax.nn.sigmoid(h) + ident


def _make_params(key, c_in, filters, k):
    ks = jax.random.split(key, 14)
    return {
        "w1": 0.1 * jax.random.normal(ks[0], (filters, c_in, k), jnp.float32),
        "b1": 0.1 * jax.random.normal(ks[1], (filters,), jnp.float32),
        "bn1_gamma": 1.0 + 0.1 * jax.random.normal(ks[2], (filters,), jnp.float32),
        "bn1_beta": 0.1 * jax.random.normal(ks[3], (filters,), jnp.float32),
        "bn1_mean": 0.1 * jax.random.normal(ks[4], (filters,), jnp.float32),
        "bn1_var": 0.5 + jnp.abs(jax.random.normal(ks[5], (filters,), jnp.float32)),
        "w2": 0.1 * jax.random.normal(ks[6], (filters, filters, k), jnp.float32),
        "b2": 0.1 * jax.random.normal(ks[7], (filters,), jnp.float32),
        "bn2_gamma": 1.0 + 0.1 * jax.random.normal(ks[8], (filters,), jnp.float32),
        "bn2_beta": 0.1 * jax.random.normal(ks[9], (filters,), jnp.float32),
        "bn2_mean": 0.1 * jax.random.normal(ks[10], (filters,), jnp.float32),
        "bn2_var": 0.5 + jnp.abs(jax.random.normal(ks[11], (filters,), jnp.float32)),
        "wr": 0.1 * jax.random.normal(ks[12], (filters, c_in, 1), jnp.float32),
        "br": 0.1 * jax.random.normal(ks[13], (filters,), jnp.float32),
    }


if __name__ == "__main__":
    B, FEATURE_DIM, FILTERS, T = 2, 8, 16, 128
    KERNEL_SIZE, DILATION = 3, 2

    key = jax.random.PRNGKey(0)
    kp, kx1, kx2, kp_eq, kx3 = jax.random.split(key, 5)
    params = _make_params(kp, FEATURE_DIM, FILTERS, KERNEL_SIZE)
    x = jax.random.normal(kx1, (B, FEATURE_DIM, T), jnp.float32)

    # f32 path (exact parity, resample residual branch).
    out = jax.block_until_ready(
        temporal_aware_block(x, params, kernel_size=KERNEL_SIZE, dilation=DILATION))
    ref = _reference(x, params, kernel_size=KERNEL_SIZE, dilation=DILATION)
    assert out.shape == (B, FILTERS, T)
    assert jnp.allclose(out, ref, rtol=1e-5, atol=1e-5), \
        f"max abs diff {jnp.max(jnp.abs(out - ref))}"

    # Non-multiple-of-128 time length exercises the lane-padding path.
    x2 = jax.random.normal(kx2, (B, FEATURE_DIM, 100), jnp.float32)
    out2 = jax.block_until_ready(
        temporal_aware_block(x2, params, kernel_size=KERNEL_SIZE, dilation=DILATION))
    ref2 = _reference(x2, params, kernel_size=KERNEL_SIZE, dilation=DILATION)
    assert jnp.allclose(out2, ref2, rtol=1e-5, atol=1e-5), \
        f"max abs diff {jnp.max(jnp.abs(out2 - ref2))}"

    # bf16 compute path (recommended default on v6e/v7x): bf16 MXU, f32 accum.
    out_bf = jax.block_until_ready(
        temporal_aware_block(x, params, kernel_size=KERNEL_SIZE,
                             dilation=DILATION, compute_dtype=jnp.bfloat16))
    assert jnp.max(jnp.abs(out_bf - ref)) < 5e-2, \
        f"bf16 max abs diff {jnp.max(jnp.abs(out_bf - ref))}"

    # Same-channel config exercises the no-resample (identity) residual branch.
    params_eq = _make_params(kp_eq, FILTERS, FILTERS, KERNEL_SIZE)
    x3 = jax.random.normal(kx3, (B, FILTERS, T), jnp.float32)
    out3 = jax.block_until_ready(
        temporal_aware_block(x3, params_eq, kernel_size=KERNEL_SIZE, dilation=DILATION))
    ref3 = _reference(x3, params_eq, kernel_size=KERNEL_SIZE, dilation=DILATION)
    assert jnp.allclose(out3, ref3, rtol=1e-5, atol=1e-5), \
        f"max abs diff {jnp.max(jnp.abs(out3 - ref3))}"

    print("KERNEL_OK")
</pallas_src>

<mosaic_0001>
module attributes {stable_mosaic.version = 11 : i64} {
  func.func @_tab_kernel(%arg0: i32, %arg1: memref<1x8x128xf32, #tpu.memory_space<vmem>>, %arg2: memref<3x16x8xf32, #tpu.memory_space<vmem>>, %arg3: memref<16x1xf32, #tpu.memory_space<vmem>>, %arg4: memref<3x16x16xf32, #tpu.memory_space<vmem>>, %arg5: memref<16x1xf32, #tpu.memory_space<vmem>>, %arg6: memref<16x8xf32, #tpu.memory_space<vmem>>, %arg7: memref<16x1xf32, #tpu.memory_space<vmem>>, %arg8: memref<1x16x128xf32, #tpu.memory_space<vmem>>, %arg9: memref<8x256xf32, #tpu.memory_space<vmem>>, %arg10: memref<16x256xf32, #tpu.memory_space<vmem>>) attributes {dimension_semantics = [#tpu.dimension_semantics<parallel>], iteration_bounds = array<i64: 2>, scalar_prefetch = 0 : i64, scratch_operands = 2 : i64, tpu.core_type = #tpu.core_type<tc>, window_params = [{transform_indices = @transform_0, window_bounds = array<i64: 1, 8, 128>}, {pipeline_mode = #tpu.pipeline_mode<synchronous>, transform_indices = @transform_1, window_bounds = array<i64: 3, 16, 8>}, {pipeline_mode = #tpu.pipeline_mode<synchronous>, transform_indices = @transform_2, window_bounds = array<i64: 16, 1>}, {pipeline_mode = #tpu.pipeline_mode<synchronous>, transform_indices = @transform_3, window_bounds = array<i64: 3, 16, 16>}, {pipeline_mode = #tpu.pipeline_mode<synchronous>, transform_indices = @transform_4, window_bounds = array<i64: 16, 1>}, {pipeline_mode = #tpu.pipeline_mode<synchronous>, transform_indices = @transform_5, window_bounds = array<i64: 16, 8>}, {pipeline_mode = #tpu.pipeline_mode<synchronous>, transform_indices = @transform_6, window_bounds = array<i64: 16, 1>}, {transform_indices = @transform_7, window_bounds = array<i64: 1, 16, 128>}]} {
    %c0 = arith.constant 0 : index
    %c0_0 = arith.constant 0 : index
    %c0_1 = arith.constant 0 : index
    %0 = vector.load %arg1[%c0, %c0_0, %c0_1] : memref<1x8x128xf32, #tpu.memory_space<vmem>>, vector<1x8x128xf32>
    %1 = vector.shape_cast %0 : vector<1x8x128xf32> to vector<8x128xf32>
    %cst = arith.constant 0.000000e+00 : f32
    %2 = vector.broadcast %cst : f32 to vector<8x128xf32>
    %c0_2 = arith.constant 0 : index
    %c0_3 = arith.constant 0 : index
    %3 = vector.load %arg9[%c0_2, %c0_3] : memref<8x256xf32, #tpu.memory_space<vmem>>, vector<8x128xf32>
    tpu.vector_store %arg9[%c0_2, %c0_3], %2 {strides = array<i32>} : memref<8x256xf32, #tpu.memory_space<vmem>>, vector<8x128xf32>,
    %cst_4 = arith.constant 0.000000e+00 : f32
    %4 = vector.broadcast %cst_4 : f32 to vector<16x128xf32>
    %c0_5 = arith.constant 0 : index
    %c0_6 = arith.constant 0 : index
    %5 = vector.load %arg10[%c0_5, %c0_6] : memref<16x256xf32, #tpu.memory_space<vmem>>, vector<16x128xf32>
    tpu.vector_store %arg10[%c0_5, %c0_6], %4 {strides = array<i32>} : memref<16x256xf32, #tpu.memory_space<vmem>>, vector<16x128xf32>,
    %c0_7 = arith.constant 0 : index
    %c128 = arith.constant 128 : index
    %6 = vector.load %arg9[%c0_7, %c128] : memref<8x256xf32, #tpu.memory_space<vmem>>, vector<8x128xf32>
    tpu.vector_store %arg9[%c0_7, %c128], %1 {strides = array<i32>} : memref<8x256xf32, #tpu.memory_space<vmem>>, vector<8x128xf32>,
    %c0_8 = arith.constant 0 : index
    %c124 = arith.constant 124 : index
    %7 = vector.load %arg9[%c0_8, %c124] : memref<8x256xf32, #tpu.memory_space<vmem>>, vector<8x128xf32>
    %c0_9 = arith.constant 0 : index
    %c0_10 = arith.constant 0 : index
    %c0_11 = arith.constant 0 : index
    %8 = vector.load %arg2[%c0_9, %c0_10, %c0_11] : memref<3x16x8xf32, #tpu.memory_space<vmem>>, vector<1x16x8xf32>
    %9 = vector.shape_cast %8 : vector<1x16x8xf32> to vector<16x8xf32>
    %cst_12 = arith.constant dense<0.000000e+00> : vector<16x128xf32>
    %10 = tpu.matmul %9, %7, %cst_12 {dimension_numbers = #tpu.dot_dimension_numbers<[1], [0], [0], [1], [0, 0, 1, 1], [], []>} : vector<16x8xf32>, vector<8x128xf32>, vector<16x128xf32> -> vector<16x128xf32>
    %c0_13 = arith.constant 0 : index
    %c126 = arith.constant 126 : index
    %11 = vector.load %arg9[%c0_13, %c126] : memref<8x256xf32, #tpu.memory_space<vmem>>, vector<8x128xf32>
    %c1 = arith.constant 1 : index
    %c0_14 = arith.constant 0 : index
    %c0_15 = arith.constant 0 : index
    %12 = vector.load %arg2[%c1, %c0_14, %c0_15] : memref<3x16x8xf32, #tpu.memory_space<vmem>>, vector<1x16x8xf32>
    %13 = vector.shape_cast %12 : vector<1x16x8xf32> to vector<16x8xf32>
    %cst_16 = arith.constant dense<0.000000e+00> : vector<16x128xf32>
    %14 = tpu.matmul %13, %11, %cst_16 {dimension_numbers = #tpu.dot_dimension_numbers<[1], [0], [0], [1], [0, 0, 1, 1], [], []>} : vector<16x8xf32>, vector<8x128xf32>, vector<16x128xf32> -> vector<16x128xf32>
    %15 = arith.addf %10, %14 : vector<16x128xf32>
    %c0_17 = arith.constant 0 : index
    %c128_18 = arith.constant 128 : index
    %16 = vector.load %arg9[%c0_17, %c128_18] : memref<8x256xf32, #tpu.memory_space<vmem>>, vector<8x128xf32>
    %c2 = arith.constant 2 : index
    %c0_19 = arith.constant 0 : index
    %c0_20 = arith.constant 0 : index
    %17 = vector.load %arg2[%c2, %c0_19, %c0_20] : memref<3x16x8xf32, #tpu.memory_space<vmem>>, vector<1x16x8xf32>
    %18 = vector.shape_cast %17 : vector<1x16x8xf32> to vector<16x8xf32>
    %cst_21 = arith.constant dense<0.000000e+00> : vector<16x128xf32>
    %19 = tpu.matmul %18, %16, %cst_21 {dimension_numbers = #tpu.dot_dimension_numbers<[1], [0], [0], [1], [0, 0, 1, 1], [], []>} : vector<16x8xf32>, vector<8x128xf32>, vector<16x128xf32> -> vector<16x128xf32>
    %20 = arith.addf %15, %19 : vector<16x128xf32>
    %c0_22 = arith.constant 0 : index
    %c0_23 = arith.constant 0 : index
    %21 = vector.load %arg3[%c0_22, %c0_23] : memref<16x1xf32, #tpu.memory_space<vmem>>, vector<16x1xf32>
    %22 = vector.broadcast %21 : vector<16x1xf32> to vector<16x128xf32>
    %23 = arith.addf %20, %22 : vector<16x128xf32>
    %cst_24 = arith.constant 0.000000e+00 : f32
    %24 = vector.broadcast %cst_24 : f32 to vector<16x128xf32>
    %25 = arith.maximumf %23, %24 : vector<16x128xf32>
    %c0_25 = arith.constant 0 : index
    %c0_26 = arith.constant 0 : index
    %26 = vector.load %arg6[%c0_25, %c0_26] : memref<16x8xf32, #tpu.memory_space<vmem>>, vector<16x8xf32>
    %cst_27 = arith.constant dense<0.000000e+00> : vector<16x128xf32>
    %27 = tpu.matmul %26, %1, %cst_27 {dimension_numbers = #tpu.dot_dimension_numbers<[1], [0], [0], [1], [0, 0, 1, 1], [], []>} : vector<16x8xf32>, vector<8x128xf32>, vector<16x128xf32> -> vector<16x128xf32>
    %c0_28 = arith.constant 0 : index
    %c0_29 = arith.constant 0 : index
    %28 = vector.load %arg7[%c0_28, %c0_29] : memref<16x1xf32, #tpu.memory_space<vmem>>, vector<16x1xf32>
    %29 = vector.broadcast %28 : vector<16x1xf32> to vector<16x128xf32>
    %30 = arith.addf %27, %29 : vector<16x128xf32>
    %c0_30 = arith.constant 0 : index
    %c128_31 = arith.constant 128 : index
    %31 = vector.load %arg10[%c0_30, %c128_31] : memref<16x256xf32, #tpu.memory_space<vmem>>, vector<16x128xf32>
    tpu.vector_store %arg10[%c0_30, %c128_31], %25 {strides = array<i32>} : memref<16x256xf32, #tpu.memory_space<vmem>>, vector<16x128xf32>,
    %c0_32 = arith.constant 0 : index
    %c124_33 = arith.constant 124 : index
    %32 = vector.load %arg10[%c0_32, %c124_33] : memref<16x256xf32, #tpu.memory_space<vmem>>, vector<16x128xf32>
    %c0_34 = arith.constant 0 : index
    %c0_35 = arith.constant 0 : index
    %c0_36 = arith.constant 0 : index
    %33 = vector.load %arg4[%c0_34, %c0_35, %c0_36] : memref<3x16x16xf32, #tpu.memory_space<vmem>>, vector<1x16x16xf32>
    %34 = vector.shape_cast %33 : vector<1x16x16xf32> to vector<16x16xf32>
    %cst_37 = arith.constant dense<0.000000e+00> : vector<16x128xf32>
    %35 = tpu.matmul %34, %32, %cst_37 {dimension_numbers = #tpu.dot_dimension_numbers<[1], [0], [0], [1], [0, 0, 1, 1], [], []>} : vector<16x16xf32>, vector<16x128xf32>, vector<16x128xf32> -> vector<16x128xf32>
    %c0_38 = arith.constant 0 : index
    %c126_39 = arith.constant 126 : index
    %36 = vector.load %arg10[%c0_38, %c126_39] : memref<16x256xf32, #tpu.memory_space<vmem>>, vector<16x128xf32>
    %c1_40 = arith.constant 1 : index
    %c0_41 = arith.constant 0 : index
    %c0_42 = arith.constant 0 : index
    %37 = vector.load %arg4[%c1_40, %c0_41, %c0_42] : memref<3x16x16xf32, #tpu.memory_space<vmem>>, vector<1x16x16xf32>
    %38 = vector.shape_cast %37 : vector<1x16x16xf32> to vector<16x16xf32>
    %cst_43 = arith.constant dense<0.000000e+00> : vector<16x128xf32>
    %39 = tpu.matmul %38, %36, %cst_43 {dimension_numbers = #tpu.dot_dimension_numbers<[1], [0], [0], [1], [0, 0, 1, 1], [], []>} : vector<16x16xf32>, vector<16x128xf32>, vector<16x128xf32> -> vector<16x128xf32>
    %40 = arith.addf %35, %39 : vector<16x128xf32>
    %c0_44 = arith.constant 0 : index
    %c128_45 = arith.constant 128 : index
    %41 = vector.load %arg10[%c0_44, %c128_45] : memref<16x256xf32, #tpu.memory_space<vmem>>, vector<16x128xf32>
    %c2_46 = arith.constant 2 : index
    %c0_47 = arith.constant 0 : index
    %c0_48 = arith.constant 0 : index
    %42 = vector.load %arg4[%c2_46, %c0_47, %c0_48] : memref<3x16x16xf32, #tpu.memory_space<vmem>>, vector<1x16x16xf32>
    %43 = vector.shape_cast %42 : vector<1x16x16xf32> to vector<16x16xf32>
    %cst_49 = arith.constant dense<0.000000e+00> : vector<16x128xf32>
    %44 = tpu.matmul %43, %41, %cst_49 {dimension_numbers = #tpu.dot_dimension_numbers<[1], [0], [0], [1], [0, 0, 1, 1], [], []>} : vector<16x16xf32>, vector<16x128xf32>, vector<16x128xf32> -> vector<16x128xf32>
    %45 = arith.addf %40, %44 : vector<16x128xf32>
    %c0_50 = arith.constant 0 : index
    %c0_51 = arith.constant 0 : index
    %46 = vector.load %arg5[%c0_50, %c0_51] : memref<16x1xf32, #tpu.memory_space<vmem>>, vector<16x1xf32>
    %47 = vector.broadcast %46 : vector<16x1xf32> to vector<16x128xf32>
    %48 = arith.addf %45, %47 : vector<16x128xf32>
    %cst_52 = arith.constant 0.000000e+00 : f32
    %49 = vector.broadcast %cst_52 : f32 to vector<16x128xf32>
    %50 = arith.maximumf %48, %49 : vector<16x128xf32>
    %cst_53 = arith.constant 0.000000e+00 : f32
    %51 = vector.broadcast %cst_53 : f32 to vector<16x128xf32>
    %52 = arith.subf %51, %50 : vector<16x128xf32>
    %53 = math.exp %52 : vector<16x128xf32>
    %cst_54 = arith.constant 1.000000e+00 : f32
    %54 = vector.broadcast %cst_54 : f32 to vector<16x128xf32>
    %55 = arith.addf %54, %53 : vector<16x128xf32>
    %56 = tpu.reciprocal %55 : vector<16x128xf32> -> vector<16x128xf32>
    %57 = arith.addf %56, %30 : vector<16x128xf32>
    %c0_55 = arith.constant 0 : index
    %c0_56 = arith.constant 0 : index
    %c0_57 = arith.constant 0 : index
    %58 = vector.load %arg8[%c0_55, %c0_56, %c0_57] : memref<1x16x128xf32, #tpu.memory_space<vmem>>, vector<1x16x128xf32>
    %59 = vector.shape_cast %58 : vector<1x16x128xf32> to vector<16x128xf32>
    %60 = vector.shape_cast %57 : vector<16x128xf32> to vector<1x16x128xf32>
    tpu.vector_store %arg8[%c0_55, %c0_56, %c0_57], %60 {strides = array<i32>} : memref<1x16x128xf32, #tpu.memory_space<vmem>>, vector<1x16x128xf32>,
    return
  }
  func.func @transform_0(%arg0: i32) -> (i32, i32, i32) {
    %c0_i32 = arith.constant 0 : i32
    %c0_i32_0 = arith.constant 0 : i32
    %c0_i32_1 = arith.constant 0 : i32
    return %arg0, %c0_i32, %c0_i32_0 : i32, i32, i32
  }
  func.func @transform_1(%arg0: i32) -> (i32, i32, i32) {
    %c0_i32 = arith.constant 0 : i32
    %c0_i32_0 = arith.constant 0 : i32
    %c0_i32_1 = arith.constant 0 : i32
    %c0_i32_2 = arith.constant 0 : i32
    return %c0_i32, %c0_i32_0, %c0_i32_1 : i32, i32, i32
  }
  func.func @transform_2(%arg0: i32) -> (i32, i32) {
    %c0_i32 = arith.constant 0 : i32
    %c0_i32_0 = arith.constant 0 : i32
    %c0_i32_1 = arith.constant 0 : i32
    return %c0_i32, %c0_i32_0 : i32, i32
  }
  func.func @transform_3(%arg0: i32) -> (i32, i32, i32) {
    %c0_i32 = arith.constant 0 : i32
    %c0_i32_0 = arith.constant 0 : i32
    %c0_i32_1 = arith.constant 0 : i32
    %c0_i32_2 = arith.constant 0 : i32
    return %c0_i32, %c0_i32_0, %c0_i32_1 : i32, i32, i32
  }
  func.func @transform_4(%arg0: i32) -> (i32, i32) {
    %c0_i32 = arith.constant 0 : i32
    %c0_i32_0 = arith.constant 0 : i32
    %c0_i32_1 = arith.constant 0 : i32
    return %c0_i32, %c0_i32_0 : i32, i32
  }
  func.func @transform_5(%arg0: i32) -> (i32, i32) {
    %c0_i32 = arith.constant 0 : i32
    %c0_i32_0 = arith.constant 0 : i32
    %c0_i32_1 = arith.constant 0 : i32
    return %c0_i32, %c0_i32_0 : i32, i32
  }
  func.func @transform_6(%arg0: i32) -> (i32, i32) {
    %c0_i32 = arith.constant 0 : i32
    %c0_i32_0 = arith.constant 0 : i32
    %c0_i32_1 = arith.constant 0 : i32
    return %c0_i32, %c0_i32_0 : i32, i32
  }
  func.func @transform_7(%arg0: i32) -> (i32, i32, i32) {
    %c0_i32 = arith.constant 0 : i32
    %c0_i32_0 = arith.constant 0 : i32
    %c0_i32_1 = arith.constant 0 : i32
    return %arg0, %c0_i32, %c0_i32_0 : i32, i32, i32
  }
}

</mosaic_0001>

<bundles_post_ra>
// kernel: tpu_custom_call.1
= control target key start
LH: loop header
LB: loop body
LE: loop exit
PB: predicated region body
PF: predicated region fallthrough
CT: control target
= control target key end

     0   :  { %12 = vsyncpa [#allocation5], 0  ;;  %s1521_s0 = inlined_call_operand.vmem [shape: f32[2,8,128], index: 0, kind: input, shape index: {}]   ;;  %s1522_s1 = inlined_call_operand.vmem [shape: f32[3,16,8], index: 1, kind: input, shape index: {}]   ;;  %s1523_s2 = inlined_call_operand.vmem [shape: f32[16,1], index: 2, kind: input, shape index: {}]   ;;  %s1524_s3 = inlined_call_operand.vmem [shape: f32[3,16,16], index: 3, kind: input, shape index: {}]   ;;  %s1525_s4 = inlined_call_operand.vmem [shape: f32[16,1], index: 4, kind: input, shape index: {}]   ;;  %s1526_s5 = inlined_call_operand.vmem [shape: f32[16,8], index: 5, kind: input, shape index: {}]   ;;  %s1527_s6 = inlined_call_operand.vmem [shape: f32[16,1], index: 6, kind: input, shape index: {}]   ;;  %s1528_s7 = inlined_call_operand.hbm [shape: f32[2,16,128], index: 7, kind: output, shape index: {}]  }
   0x1   :  { %14 = vsyncpa [#allocation5 + $0x1], 0  ;;  %s1329_s24 = smov 0   ;;  %s1331_s25 = smov 0  }
   0x2   :  { %s1333_s26 = smov 0   ;;  %s1335_s27 = smov 0  }
   0x3 LB: > { %s1350_s28 = sadd.s32 4294967295, %s1280_s27   ;;  %s1056_s29 = sadd.s32 4294967294, %s1280_s27   ;;  %s1280_s27 = sphi %s1335_s27, %s1534_s27   ;;  %s1276_s26 = sphi %s1333_s26, %s1533_s26   ;;  %s1272_s25 = sphi %s1331_s25, %s1532_s25   ;;  %s1268_s24 = sphi %s1329_s24, %s1531_s24  }
   0x4   : > { %s1354_s30 = sadd.s32 1, %s1280_s27   ;;  %s179_s8 = sadd.s32 1, %s1276_s26 }
   0x5   : > { %s176_s9 = ssub.s32 %s1280_s27, %s1354_s30  ;;  %p189_p0 = scmp.ne.s32.totalorder %s1276_s26, %s1272_s25 }
   0x6   : > { %p177_p1 = scmp.eq.s32.totalorder %s176_s9, 0  ;;  %p190_p2 = scmp.eq.s32.totalorder %s1350_s28, 1 }
   0x7   : > { %p195_p3 = scmp.ne.s32.totalorder %s1272_s25, %s1268_s24  ;;  %p196_p4 = scmp.eq.s32.totalorder %s1056_s29, 1 }
   0x8   : > { %s1365_s10 = scalar_select %p177_p1, %s1276_s26, %s179_s8  }
   0x9   : > { %p1367_p5 = por %p190_p2, %p189_p0  ;;  %p1371_p6 = por %p196_p4, %p195_p3 }
   0xa   : > { %p1059_p7 = scmp.ge.s32.totalorder %s1280_s27, 1  ;;  %p239_p8 = scmp.lt.s32.totalorder %s1280_s27, 3 }
   0xc   : > { %p240_p9 = pnand %p1059_p7, %p239_p8 }
   0xd   : > { %s1283_s15 = smov (!%p240_p9), 4   ;;  %s1284_s16 = smov (!%p240_p9), 2  }
   0xe   : > { %243 = sbr.rel (%p240_p9) target bundleno = 724 (0x2d4), region = 48  ;;  %p270_p10 = scmp.lt.s32.totalorder (!%p240_p9), %s1350_s28, 1 }
   0xf   : > { %s267_s22 = sand.u32 (!%p240_p9), 1, %s1272_s25   ;;  %s1089_s29 = sshll.u32 (!%p240_p9), %s1350_s28, 8 }
  0x10   : > { %s1477_s13 = scalar_lea.hbm (!%p240_p9), %s1528_s7, %s1089_s29  ;;  %s1286_s17 = smov (!%p240_p9), [#allocation4]  }
  0x11   : > { %s1224_s18 = sshll.u32 (!%p240_p9), %s1286_s17, 4  ;;  %s1225_s18 = int_to_ptr.vmem [resolvable:$false] %s1224_s18 }
  0x13   : > { %v1062_v0 = vld [vmem:[%s1522_s1 + $0x10] sm:$0xff]  ;;  %v1282_v1 = vmov 0.0   ;;  %vm295_vm0 = vcmask 64512   ;;  %v281_v2 = vld [vmem:[%s1522_s1] sm:$0xff]  ;;  %s271_s19 = scalar_select %p270_p10, %s1350_s28, 1  ;;  %v1285_v3 = vmov 0  }
  0x14   : > { %377 = vrot.lane.b32.xlu1 %v1282_v1, %s1283_s15  ;;  %288 = vrot.lane.b32.xlu0 %v1282_v1, %s1284_s16  ;;  %v552_v5 = vld [vmem:[%s1523_s2 + $0x8] sm:$0xff]  ;;  %v551_v6 = vld [vmem:[%s1523_s2] sm:$0xff]  ;;  %vm292_vm1 = vcmask 15360   ;;  %vm381_vm2 = vcmask 31744   ;;  %vm689_vm3 = vcmask 130048   ;;  %s1481_s28 = scalar_lea.sflag [#allocation5], %s267_s22 }
  0x15   : > { %1116 = vmatprep.mubr.msk.f32.mxu0 %vm295_vm0, %v1062_v0  ;;  %1121 = vmatprep.mubr.msk.f32.mxu1 %vm295_vm0, %v281_v2  ;;  %s1061_s20 = sshll.u32 %s271_s19, 3  ;;  %v1063_v13 = vld [vmem:[%s1522_s1 + $0x18] sm:$0xff]  ;;  %v282_v14 = vld [vmem:[%s1522_s1 + $0x8] sm:$0xff]  ;;  %v1068_v15 = vld [vmem:[%s1522_s1 + $0x20] sm:$0xff]  ;;  %s1226_s19 = scalar_lea.vmem %s1225_s18, 512 }
  0x16   : > { %1200 = vset.pattern.permute.xlu0 %v1285_v3  ;;  %1201 = vset.pattern.permute.xlu1 %v1285_v3  ;;  %s273_s23 = scalar_lea.vmem %s1521_s0, %s1061_s20  ;;  %v567_v16 = vld [vmem:[%s1526_s5] sm:$0xff]  ;;  %v1069_v17 = vld [vmem:[%s1522_s1 + $0x28] sm:$0xff]  ;;  %v1074_v23 = vld [vmem:[%s1524_s3 + $0x10] sm:$0xff] }
  0x17   : > { %v274_v4 = vld [vmem:[%s273_s23] sm:$0xff]  ;;  %v568_v18 = vld [vmem:[%s1526_s5 + $0x8] sm:$0xff]  ;;  %v1075_v49 = vld [vmem:[%s1524_s3 + $0x18] sm:$0xff]  ;;  %s1060_s23 = sshll.u32 %s267_s22, 4 }
  0x18   : > { %379 = vrot.lane.b32.xlu1 %v274_v4, %s1283_s15  ;;  %290 = vrot.lane.b32.xlu0 %v274_v4, %s1284_s16  ;;  %v668_v33 = vld [vmem:[%s1524_s3] sm:$0xff]  ;;  %v951_v37 = vld [vmem:[%s1525_s4 + $0x8] sm:$0xff]  ;;  %s269_s8 = scalar_lea.vmem [#allocation4], %s1060_s23 }
  0x19   : > { %v950_v38 = vld [vmem:[%s1525_s4] sm:$0xff]  ;;  %v570_v39 = vld [vmem:[%s1527_s6 + $0x8] sm:$0xff]  ;;  %s994_s9 = sshll.u32 %s269_s8, 4  ;;  %s1479_s9 = int_to_ptr.vmem [resolvable:$true] %s994_s9 }
  0x1a   : > { %v569_v40 = vld [vmem:[%s1527_s6] sm:$0xff]  ;;  %v1081_v56 = vld [vmem:[%s1524_s3 + $0x28] sm:$0xff]  ;;  %s1220_s14 = scalar_lea.vmem %s1479_s9, 256  ;;  %p1227_p0 = scmp.lt.s32.totalorder %s1479_s9, %s1225_s18 }
  0x1b   : > { %v1080_v50 = vld [vmem:[%s1524_s3 + $0x20] sm:$0xff]  ;;  %v669_v58 = vld [vmem:[%s1524_s3 + $0x8] sm:$0xff]  ;;  %p1221_p11 = scmp.ne.s32.totalorder %s1479_s9, %s1220_s14  ;;  %p1228_p1 = scmp.lt.s32.totalorder %s1226_s19, %s1220_s14 }
  0x1c   : > { %560 = vperm.xlu0 %1200, %v552_v5   ;;  %555 = vperm.xlu1 %1201, %v551_v6  }
  0x1d   : > { %p1222_p12 = pnand %p1221_p11, %p1367_p5  ;;  %p1229_p2 = por %p1228_p1, %p1227_p0 }
  0x1f   : > { %p1223_p13 = pneg %p1222_p12 }
  0x20   : > { %1208 = vrot.lane.b32.xlu0 %v1282_v1, %s1283_s15  ;;  %1203 = vrot.lane.b32.xlu1 %v1282_v1, %s1284_s16 }
  0x21   : > { %p1230_p3 = pnand %p1229_p2, %p1223_p13 }
  0x86   : > { %v378_v7 = vpop.permute.xlu1 %377  ;;  %v289_v8 = vpop.permute.xlu0 %288 }
  0x8a   : > { %v380_v9 = vpop.permute.xlu1 %379  ;;  %v291_v10 = vpop.permute.xlu0 %290 }
  0x8b   : > { %v293_v11 = vsel %vm292_vm1, %v289_v8, %v291_v10  ;;  %v382_v12 = vsel %vm381_vm2, %v378_v7, %v380_v9 }
  0x8c   : > { %1114 = vmatprep.subr.mxu0 %v293_v11  ;;  %1119 = vmatprep.subr.mxu1 %v382_v12 }
  0x8d   : > { %1115 = vmatpush3.msra.mxu0 %v293_v11  ;;  %1120 = vmatpush3.msra.mxu1 %v382_v12 }
  0x8e   : > { %1117 = vmatmul.mubr.msk.f32.vlgmr.msra.gmra.mxu0 %vm295_vm0, %v1063_v13  ;;  %1122 = vmatmul.mubr.msk.f32.vlgmr.msra.gmra.mxu1 %vm295_vm0, %v282_v14 }
  0x8f   : > { %1124 = vmatprep.subr.mxu0 %v274_v4  ;;  %1126 = vmatprep.mubr.msk.f32.mxu0 %vm295_vm0, %v1068_v15 }
  0x90   : > { %1125 = vmatpush3.msra.mxu0 %v274_v4  ;;  %1129 = vmatprep.subr.mxu1 %v274_v4 }
  0x91   : > { %1130 = vmatpush3.msra.mxu1 %v274_v4  ;;  %1131 = vmatprep.mubr.msk.f32.mxu1 %vm295_vm0, %v567_v16 }
  0x92   : > { %1127 = vmatmul.mubr.msk.f32.vlgmr.msra.gmra.mxu0 %vm295_vm0, %v1069_v17  ;;  %1132 = vmatmul.mubr.msk.f32.vlgmr.msra.gmra.mxu1 %vm295_vm0, %v568_v18 }
  0x93   : > { %1138 = vmatprep.mubr.msk.f32.mxu0 %vm689_vm3, %v1074_v23  ;;  %1145 = vmatprep.mubr.msk.f32.mxu1 %vm689_vm3, %v668_v33 }
  0x97   : > { %v561_v26 = vpop.permute.xlu0 %560  ;;  %v556_v30 = vpop.permute.xlu1 %555 }
  0x9b   : > { %v1209_v41 = vpop.permute.xlu0 %1208  ;;  %v1204_v42 = vpop.permute.xlu1 %1203 }
  0x9c   : > { %v1205_v43 = vunpack.i.l.bf16 %v1204_v42  ;;  %v1206_v45 = vunpack.i.h.bf16 %v1204_v42  ;;  %v1210_v51 = vunpack.i.l.bf16 %v1209_v41  ;;  %v1211_v54 = vunpack.i.h.bf16 %v1209_v41 }
 0x14e   : > { %v1118_v19 = vpop.f32.mrf.mxu0  ;;  %v1123_v20 = vpop.f32.mrf.mxu1 }
 0x14f   : > { %v462_v24 = vadd.f32 %v1123_v20, %v1118_v19 }
 0x150   : > { %v368_v21 = vpop.f32.mrf.mxu0  ;;  %v456_v22 = vpop.f32.mrf.mxu1 }
 0x151   : > { %v457_v27 = vadd.f32 %v456_v22, %v368_v21 }
 0x152   : > { %v1128_v25 = vpop.f32.mrf.mxu0  ;;  %v1133_v59 = vpop.f32.mrf.mxu1 }
 0x153   : > { %v550_v28 = vadd.f32 %v1128_v25, %v462_v24 }
 0x154   : > { %v540_v29 = vpop.f32.mrf.mxu0  ;;  %v653_v62 = vpop.f32.mrf.mxu1 }
 0x155   : > { %v549_v31 = vadd.f32 %v540_v29, %v457_v27  ;;  %v564_v32 = vadd.f32 %v561_v26, %v550_v28 }
 0x157   : > { %v566_v34 = vmax.f32 %v564_v32, 0.0  ;;  %v563_v35 = vadd.f32 %v556_v30, %v549_v31 }
 0x159   : > { %v565_v36 = vmax.f32 %v563_v35, 0.0  ;;  %683 = vrot.lane.b32.xlu0 %v566_v34, %s1284_s16 }
 0x15b   : > { %679 = vrot.lane.b32.xlu1 %v565_v36, %s1284_s16 }
 0x15d   : > { %773 = vrot.lane.b32.xlu0 %v565_v36, %s1283_s15 }
 0x15f   : > { %777 = vrot.lane.b32.xlu1 %v566_v34, %s1283_s15 }
 0x161   : > { %959 = vperm.xlu0 %1200, %v951_v37  }
 0x163   : > { %954 = vperm.xlu1 %1201, %v950_v38  }
 0x165   : > { %578 = vperm.xlu0 %1200, %v570_v39  }
 0x167   : > { %573 = vperm.xlu1 %1201, %v569_v40  }
 0x1cb   : > { %v684_v44 = vpop.permute.xlu0 %683 }
 0x1cc   : > { %v686_v46 = vsel %vm292_vm1, %v1205_v43, %v684_v44 }
 0x1cd   : > { %v680_v47 = vpop.permute.xlu1 %679  ;;  %1134 = vmatprep.subr.mxu0 %v686_v46 }
 0x1ce   : > { %1135 = vmatpush3.msra.mxu0 %v686_v46  ;;  %v685_v48 = vsel %vm292_vm1, %v1206_v45, %v680_v47 }
 0x1cf   : > { %1136 = vmatprep.subr.mxu0 %v685_v48  ;;  %v774_v52 = vpop.permute.xlu0 %773 }
 0x1d0   : > { %1137 = vmatpush3.msra.mxu0 %v685_v48  ;;  %v779_v57 = vsel %vm381_vm2, %v1211_v54, %v774_v52 }
 0x1d1   : > { %v778_v53 = vpop.permute.xlu1 %777  ;;  %1148 = vmatprep.subr.mxu0 %v566_v34  ;;  %1139 = vmatmul.mubr.msk.f32.vlgmr.msra.gmra.mxu0 %vm689_vm3, %v1075_v49 }
 0x1d2   : > { %1149 = vmatpush3.msra.mxu0 %v566_v34  ;;  %v780_v55 = vsel %vm381_vm2, %v1210_v51, %v778_v53  ;;  %1152 = vmatprep.mubr.msk.f32.mxu0 %vm689_vm3, %v1080_v50 }
 0x1d3   : > { %1141 = vmatprep.subr.mxu1 %v780_v55  ;;  %1150 = vmatprep.subr.mxu0 %v565_v36 }
 0x1d4   : > { %1142 = vmatpush3.msra.mxu1 %v780_v55  ;;  %1151 = vmatpush3.msra.mxu0 %v565_v36 }
 0x1d5   : > { %1143 = vmatprep.subr.mxu1 %v779_v57  ;;  %1153 = vmatmul.mubr.msk.f32.vlgmr.msra.gmra.mxu0 %vm689_vm3, %v1081_v56 }
 0x1d6   : > { %1144 = vmatpush3.msra.mxu1 %v779_v57 }
 0x1d7   : > { %1146 = vmatmul.mubr.msk.f32.vlgmr.msra.gmra.mxu1 %vm689_vm3, %v669_v58 }
 0x1dc   : > { %v960_v5 = vpop.permute.xlu0 %959 }
 0x1de   : > { %v955_v9 = vpop.permute.xlu1 %954 }
 0x1e0   : > { %v579_v21 = vpop.permute.xlu0 %578 }
 0x1e1   : > { %v659_v23 = vadd.f32 %v1133_v59, %v579_v21 }
 0x1e2   : > { %v574_v22 = vpop.permute.xlu1 %573 }
 0x1e3   : > { %v654_v25 = vadd.f32 %v653_v62, %v574_v22 }
 0x291   : > { %v1140_v60 = vpop.f32.mrf.mxu0 }
 0x293   : > { %v762_v61 = vpop.f32.mrf.mxu0 }
 0x295   : > { %v1154_v0 = vpop.f32.mrf.mxu0 }
 0x297   : > { %v1147_v63 = vpop.f32.mrf.mxu1  ;;  %v939_v6 = vpop.f32.mrf.mxu0 }
 0x298   : > { %v861_v1 = vadd.f32 %v1147_v63, %v1140_v60 }
 0x299   : > { %v855_v2 = vpop.f32.mrf.mxu1 }
 0x29a   : > { %v949_v3 = vadd.f32 %v1154_v0, %v861_v1  ;;  %v856_v4 = vadd.f32 %v855_v2, %v762_v61 }
 0x29c   : > { %v963_v7 = vadd.f32 %v960_v5, %v949_v3  ;;  %v948_v8 = vadd.f32 %v939_v6, %v856_v4 }
 0x29e   : > { %v965_v10 = vmax.f32 %v963_v7, 0.0  ;;  %v962_v11 = vadd.f32 %v955_v9, %v948_v8 }
 0x2a0   : > { %v967_v12 = vsub.f32 0.0, %v965_v10  ;;  %v964_v13 = vmax.f32 %v962_v11, 0.0 }
 0x2a2   : > { %v970_v14 = vmul.f32 1.442695, %v967_v12  ;;  %v966_v15 = vsub.f32 0.0, %v964_v13 }
 0x2a4   : > { %1212 = vpow2.f32 %v970_v14  ;;  %v968_v16 = vmul.f32 1.442695, %v966_v15 }
 0x2a6   : > { %1214 = vpow2.f32 %v968_v16 }
 0x2b1   : > { %v1213_v17 = vpop.eup %1212 }
 0x2b2   : > { %v973_v18 = vadd.f32 1.0, %v1213_v17 }
 0x2b3   : > { %v1215_v19 = vpop.eup %1214 }
 0x2b4   : > { %1216 = vrcp.f32 %v973_v18  ;;  %v972_v20 = vadd.f32 1.0, %v1215_v19 }
 0x2b6   : > { %1218 = vrcp.f32 %v972_v20 }
 0x2c1   : > { %v1217_v24 = vpop.eup %1216 }
 0x2c2   : > { %v977_v26 = vadd.f32 %v1217_v24, %v659_v23 }
 0x2c3   : > { %v1219_v27 = vpop.eup %1218 }
 0x2c4   : > { %v976_v28 = vadd.f32 %v1219_v27, %v654_v25  ;;  %979 = vst [vmem:[%s269_s8 + $0x8] sm:$0xff] %v977_v26 }
 0x2c6   : > { %978 = vst [vmem:[%s269_s8] sm:$0xff] %v976_v28 }
 0x2c7   : > { %1233 = shalt.err (!%p1230_p3)
}
 0x2c8   : > { %s1234_s20 = scalar_lea.hbm %s1477_s13, 256  ;;  %s1238_s23 = scalar_lea.hbm %s1528_s7, 512 }
 0x2c9   : > { %p1235_p4 = scmp.ne.s32.totalorder %s1477_s13, %s1234_s20  ;;  %p1239_p9 = scmp.lt.s32.totalorder %s1477_s13, %s1528_s7 }
 0x2ca   : > { %p1240_p10 = scmp.lt.s32.totalorder %s1238_s23, %s1234_s20 }
 0x2cb   : > { %p1236_p7 = pnand %p1235_p4, %p1367_p5 }
 0x2cc   : > { %p1241_p11 = por %p1240_p10, %p1239_p9 }
 0x2cd   : > { %p1237_p8 = pneg %p1236_p7 }
 0x2cf   : > { %p1242_p12 = pnand %p1241_p11, %p1237_p8 }
 0x2d1   : > { %1245 = shalt.err (!%p1242_p12)
}
 0x2d2   : > { %s1287_s16 = smov 128   ;;  %s1288_s15 = smov 8  }
 0x2d3   : > { %1155 = dma.vmem_to_hbm [thread:$0]  (%p1367_p5), %s1479_s9, 256, %s1477_s13, %s1481_s28, %s1287_s16, %s1287_s16, %s1288_s15  }
 0x2d4 PF: > { %p1161_p13 = scmp.ge.s32.totalorder %s1280_s27, 2  ;;  %s1009_s14 = sand.u32 1, %s1268_s24  }
 0x2d5   : > { %s1010_s17 = scalar_lea.sflag [#allocation5], %s1009_s14 }
 0x2d6   : > { %p1158_p0 = pnand %p1161_p13, %p1371_p6 }
 0x2d8   : > { %p1159_p1 = pneg %p1158_p0 }
 0x2da   : > { %1263 = dma.done.wait (%p1159_p1), %s1010_s17, 256  }
 0x2db   : > { %1265 = vsyncadd (%p1159_p1), %s1010_s17, 4294967040  ;;  %p17_p2 = scmp.ge.s32.totalorder %s1354_s30, 4   ;;  %s1531_s24 = smov %s1272_s25 }
 0x2dc   : > { %s1532_s25 = smov %s1276_s26  ;;  %s1533_s26 = smov %s1365_s10 }
 0x2dd   : > { %s1534_s27 = smov %s1354_s30  ;;  %19 = sbr.rel (!%p17_p2) target bundleno = 3 (0x3), region = 87 }
 0x2e2   :  { %1015 = vsyncpa [#allocation5], 1 }
 0x2e3   :  { %1017 = vsyncpa [#allocation5 + $0x1], 1 }

</bundles_post_ra>
